<compile_context>
chip_gen: v7x
topology: tpu7x:2x2x1
jax: 0.10.0
libtpu: 0.0.40
codegen_flags: <defaults>
</compile_context>

<pallas_src>
import jax
import jax.numpy as jnp
from jax import lax
from jax.experimental import pallas as pl
from jax.experimental.pallas import tpu as pltpu


def _meanpool_conv_kernel(p_ref, w_ref, b_ref, o_ref):
    # p_ref: (4, k*k*Cin, tm)  per-pool-tap im2col columns (lane dim = tm)
    # w_ref: (Cout, k*k*Cin)   conv weights, column order (dy, dx, cin)
    # b_ref: (Cout, 1)
    # o_ref: (Cout, tm)        lane-dense output tile
    pooled = (p_ref[0] + p_ref[1] + p_ref[2] + p_ref[3]) * 0.25
    acc = jnp.dot(w_ref[...], pooled, preferred_element_type=jnp.float32)
    o_ref[...] = (acc + b_ref[...]).astype(o_ref.dtype)


def mean_pool_conv(x_nchw, weight_oihw, bias, *, kernel_size):
    n, cin, h, w = x_nchw.shape
    cout = weight_oihw.shape[0]
    k = kernel_size
    p = (k - 1) // 2
    hp, wp = h // 2, w // 2
    m = n * hp * wp
    kkc = k * k * cin

    # ---- wrapper-side layout plumbing (gather / pad / transpose only) ----
    # For each of the 4 pool taps build a zero-padded im2col matrix with
    # rows ordered (dy, dx, cin) and columns ordered (n, y, x).
    taps = []
    for ty, tx in ((0, 0), (1, 0), (0, 1), (1, 1)):
        xt = x_nchw[:, :, ty::2, tx::2]                          # (N, Cin, Hp, Wp)
        xt = jnp.pad(xt, ((0, 0), (0, 0), (p, p), (p, p)))
        patch = jnp.stack([xt[:, :, dy:dy + hp, dx:dx + wp]
                           for dy in range(k) for dx in range(k)], axis=0)
        patch = jnp.transpose(patch, (0, 2, 1, 3, 4)).reshape(kkc, m)
        taps.append(patch)
    p_taps = jnp.stack(taps, axis=0)                             # (4, kkc, M)

    # Weight OIHW -> (Cout, k*k*Cin) with column order (dy, dx, cin).
    w_mat = jnp.transpose(weight_oihw, (0, 2, 3, 1)).reshape(cout, kkc)
    b_col = bias.reshape(cout, 1)

    # Tile the fused N*Hp*Wp axis with lane-dense blocks.
    if m % 1024 == 0:
        tm = 1024
    elif m % 128 == 0:
        tm = 128
    else:
        tm = m
    grid = (m // tm,)

    out = pl.pallas_call(
        _meanpool_conv_kernel,
        out_shape=jax.ShapeDtypeStruct((cout, m), x_nchw.dtype),
        grid_spec=pltpu.PrefetchScalarGridSpec(
            num_scalar_prefetch=0,
            grid=grid,
            in_specs=[
                pl.BlockSpec((4, kkc, tm), lambda i: (0, 0, i)),
                pl.BlockSpec((cout, kkc), lambda i: (0, 0)),
                pl.BlockSpec((cout, 1), lambda i: (0, 0)),
            ],
            out_specs=pl.BlockSpec((cout, tm), lambda i: (0, i)),
        ),
        compiler_params=pltpu.CompilerParams(
            dimension_semantics=("parallel",)),
    )(p_taps, w_mat, b_col)

    # (Cout, N*Hp*Wp) -> NCHW
    out = out.reshape(cout, n, hp, wp)
    return jnp.transpose(out, (1, 0, 2, 3))


def _reference(x_nchw, weight_oihw, bias, kernel_size):
    p = (kernel_size - 1) // 2
    pooled = (x_nchw[:, :, ::2, ::2] + x_nchw[:, :, 1::2, ::2]
              + x_nchw[:, :, ::2, 1::2] + x_nchw[:, :, 1::2, 1::2]) / 4.0
    out = lax.conv_general_dilated(
        pooled, weight_oihw, window_strides=(1, 1),
        padding=[(p, p), (p, p)],
        dimension_numbers=("NCHW", "OIHW", "NCHW"))
    return out + bias.reshape(1, -1, 1, 1)


if __name__ == "__main__":
    # Module config: MeanPoolConv(input_dim=4, output_dim=8, kernel_size=3)
    N, CIN, H, W = 2, 4, 16, 16
    COUT, K = 8, 3

    key = jax.random.PRNGKey(0)
    kx, kw, kb = jax.random.split(key, 3)

    x = jax.random.normal(kx, (N, CIN, H, W), dtype=jnp.float32)
    weight = 0.1 * jax.random.normal(kw, (COUT, CIN, K, K), dtype=jnp.float32)
    bias = 0.1 * jax.random.normal(kb, (COUT,), dtype=jnp.float32)

    out = mean_pool_conv(x, weight, bias, kernel_size=K)
    out = jax.block_until_ready(out)

    ref = _reference(x, weight, bias, K)
    assert out.shape == ref.shape == (N, COUT, H // 2, W // 2)
    assert jnp.allclose(out, ref, rtol=1e-4, atol=1e-4)

    print("KERNEL_OK")
</pallas_src>

<mosaic_0001>
module attributes {stable_mosaic.version = 11 : i64} {
  func.func @_meanpool_conv_kernel(%arg0: i32, %arg1: memref<4x36x128xf32, #tpu.memory_space<vmem>>, %arg2: memref<8x36xf32, #tpu.memory_space<vmem>>, %arg3: memref<8x1xf32, #tpu.memory_space<vmem>>, %arg4: memref<8x128xf32, #tpu.memory_space<vmem>>) attributes {dimension_semantics = [#tpu.dimension_semantics<parallel>], iteration_bounds = array<i64: 1>, scalar_prefetch = 0 : i64, scratch_operands = 0 : i64, tpu.core_type = #tpu.core_type<tc>, window_params = [{transform_indices = @transform_0, window_bounds = array<i64: 4, 36, 128>}, {pipeline_mode = #tpu.pipeline_mode<synchronous>, transform_indices = @transform_1, window_bounds = array<i64: 8, 36>}, {pipeline_mode = #tpu.pipeline_mode<synchronous>, transform_indices = @transform_2, window_bounds = array<i64: 8, 1>}, {transform_indices = @transform_3, window_bounds = array<i64: 8, 128>}]} {
    %c0 = arith.constant 0 : index
    %c0_0 = arith.constant 0 : index
    %c0_1 = arith.constant 0 : index
    %0 = vector.load %arg1[%c0, %c0_0, %c0_1] : memref<4x36x128xf32, #tpu.memory_space<vmem>>, vector<1x36x128xf32>
    %1 = vector.shape_cast %0 : vector<1x36x128xf32> to vector<36x128xf32>
    %c1 = arith.constant 1 : index
    %c0_2 = arith.constant 0 : index
    %c0_3 = arith.constant 0 : index
    %2 = vector.load %arg1[%c1, %c0_2, %c0_3] : memref<4x36x128xf32, #tpu.memory_space<vmem>>, vector<1x36x128xf32>
    %3 = vector.shape_cast %2 : vector<1x36x128xf32> to vector<36x128xf32>
    %4 = arith.addf %1, %3 : vector<36x128xf32>
    %c2 = arith.constant 2 : index
    %c0_4 = arith.constant 0 : index
    %c0_5 = arith.constant 0 : index
    %5 = vector.load %arg1[%c2, %c0_4, %c0_5] : memref<4x36x128xf32, #tpu.memory_space<vmem>>, vector<1x36x128xf32>
    %6 = vector.shape_cast %5 : vector<1x36x128xf32> to vector<36x128xf32>
    %7 = arith.addf %4, %6 : vector<36x128xf32>
    %c3 = arith.constant 3 : index
    %c0_6 = arith.constant 0 : index
    %c0_7 = arith.constant 0 : index
    %8 = vector.load %arg1[%c3, %c0_6, %c0_7] : memref<4x36x128xf32, #tpu.memory_space<vmem>>, vector<1x36x128xf32>
    %9 = vector.shape_cast %8 : vector<1x36x128xf32> to vector<36x128xf32>
    %10 = arith.addf %7, %9 : vector<36x128xf32>
    %cst = arith.constant 2.500000e-01 : f32
    %11 = vector.broadcast %cst : f32 to vector<36x128xf32>
    %12 = arith.mulf %10, %11 : vector<36x128xf32>
    %c0_8 = arith.constant 0 : index
    %c0_9 = arith.constant 0 : index
    %13 = vector.load %arg2[%c0_8, %c0_9] : memref<8x36xf32, #tpu.memory_space<vmem>>, vector<8x36xf32>
    %cst_10 = arith.constant dense<0.000000e+00> : vector<8x128xf32>
    %14 = tpu.matmul %13, %12, %cst_10 {dimension_numbers = #tpu.dot_dimension_numbers<[1], [0], [0], [1], [0, 0, 1, 1], [], []>} : vector<8x36xf32>, vector<36x128xf32>, vector<8x128xf32> -> vector<8x128xf32>
    %c0_11 = arith.constant 0 : index
    %c0_12 = arith.constant 0 : index
    %15 = vector.load %arg3[%c0_11, %c0_12] : memref<8x1xf32, #tpu.memory_space<vmem>>, vector<8x1xf32>
    %16 = vector.broadcast %15 : vector<8x1xf32> to vector<8x128xf32>
    %17 = arith.addf %14, %16 : vector<8x128xf32>
    %c0_13 = arith.constant 0 : index
    %c0_14 = arith.constant 0 : index
    %18 = vector.load %arg4[%c0_13, %c0_14] : memref<8x128xf32, #tpu.memory_space<vmem>>, vector<8x128xf32>
    tpu.vector_store %arg4[%c0_13, %c0_14], %17 {strides = array<i32>} : memref<8x128xf32, #tpu.memory_space<vmem>>, vector<8x128xf32>,
    return
  }
  func.func @transform_0(%arg0: i32) -> (i32, i32, i32) {
    %c0_i32 = arith.constant 0 : i32
    %c0_i32_0 = arith.constant 0 : i32
    %c0_i32_1 = arith.constant 0 : i32
    return %c0_i32, %c0_i32_0, %arg0 : i32, i32, i32
  }
  func.func @transform_1(%arg0: i32) -> (i32, i32) {
    %c0_i32 = arith.constant 0 : i32
    %c0_i32_0 = arith.constant 0 : i32
    %c0_i32_1 = arith.constant 0 : i32
    return %c0_i32, %c0_i32_0 : i32, i32
  }
  func.func @transform_2(%arg0: i32) -> (i32, i32) {
    %c0_i32 = arith.constant 0 : i32
    %c0_i32_0 = arith.constant 0 : i32
    %c0_i32_1 = arith.constant 0 : i32
    return %c0_i32, %c0_i32_0 : i32, i32
  }
  func.func @transform_3(%arg0: i32) -> (i32, i32) {
    %c0_i32 = arith.constant 0 : i32
    %c0_i32_0 = arith.constant 0 : i32
    return %c0_i32, %arg0 : i32, i32
  }
}

</mosaic_0001>

<bundles_post_ra>
// kernel: tpu_custom_call.1
= control target key start
LH: loop header
LB: loop body
LE: loop exit
PB: predicated region body
PF: predicated region fallthrough
CT: control target
= control target key end

     0   :  { %v230_v3 = vmov 0.0|0.0   ;;  %vm231_vm0 = vmmov 0   ;;  %v232_v12 = vmov 0.0   ;;  %v233_v13 = vmov 0   ;;  %s333_s0 = inlined_call_operand.vmem [shape: f32[4,36,128], index: 0, kind: input, shape index: {}]   ;;  %s334_s1 = inlined_call_operand.vmem [shape: f32[8,36], index: 1, kind: input, shape index: {}]   ;;  %s335_s2 = inlined_call_operand.vmem [shape: f32[8,1], index: 2, kind: input, shape index: {}]   ;;  %s336_s3 = inlined_call_operand.hbm [shape: f32[8,128], index: 3, kind: output, shape index: {}]  }
   0x1   :  { %v15_v0 = vld [vmem:[%s333_s0] sm:$0xff]  ;;  %v16_v1 = vld [vmem:[%s333_s0 + $0x8] sm:$0xff]  ;;  %194 = vmatprep.subr.bf16.mxu0 %v230_v3  ;;  %v159_v4 = vld [vmem:[%s333_s0 + $0x30] sm:$0xff]  ;;  %191 = vmatprep.mubr.msk.f32.mxu0 %vm231_vm0, %v232_v12 }
   0x2   :  { %v158_v2 = vld [vmem:[%s333_s0 + $0x28] sm:$0xff]  ;;  %v163_v6 = vld [vmem:[%s333_s0 + $0x50] sm:$0xff]  ;;  %v164_v7 = vld [vmem:[%s333_s0 + $0x58] sm:$0xff]  ;;  %v27_v8 = vadd.f32 %v159_v4, %v16_v1  ;;  %205 = vset.pattern.permute.xlu0 %v233_v13 }
   0x3   :  { %v26_v5 = vadd.f32 %v158_v2, %v15_v0  ;;  %v168_v9 = vld [vmem:[%s333_s0 + $0x78] sm:$0xff]  ;;  %v169_v10 = vld [vmem:[%s333_s0 + $0x80] sm:$0xff]  ;;  %v17_v11 = vld [vmem:[%s333_s0 + $0x10] sm:$0xff] }
   0x4   :  { %v18_v15 = vld [vmem:[%s333_s0 + $0x18] sm:$0xff]  ;;  %v161_v17 = vld [vmem:[%s333_s0 + $0x40] sm:$0xff]  ;;  %v38_v18 = vadd.f32 %v164_v7, %v27_v8  ;;  %v166_v22 = vld [vmem:[%s333_s0 + $0x68] sm:$0xff] }
   0x5   :  { %v37_v14 = vadd.f32 %v163_v6, %v26_v5  ;;  %v160_v16 = vld [vmem:[%s333_s0 + $0x38] sm:$0xff]  ;;  %v29_v20 = vadd.f32 %v161_v17, %v18_v15  ;;  %v165_v21 = vld [vmem:[%s333_s0 + $0x60] sm:$0xff]  ;;  %v170_v23 = vld [vmem:[%s333_s0 + $0x88] sm:$0xff] }
   0x6   :  { %v28_v19 = vadd.f32 %v160_v16, %v17_v11  ;;  %v171_v25 = vld [vmem:[%s333_s0 + $0x90] sm:$0xff]  ;;  %v19_v26 = vld [vmem:[%s333_s0 + $0x20] sm:$0xf]  ;;  %v162_v27 = vld [vmem:[%s333_s0 + $0x48] sm:$0xf]  ;;  %v49_v28 = vadd.f32 %v169_v10, %v38_v18 }
   0x7   :  { %v48_v24 = vadd.f32 %v168_v9, %v37_v14  ;;  %v40_v30 = vadd.f32 %v166_v22, %v29_v20  ;;  %v30_v31 = vadd.f32 %v162_v27, %v19_v26  ;;  %v167_v32 = vld [vmem:[%s333_s0 + $0x70] sm:$0xf]  ;;  %v59_v34 = vld [vmem:[%s335_s2] sm:$0xff] }
   0x8   :  { %v39_v29 = vadd.f32 %v165_v21, %v28_v19 }
   0x9   :  { %v53_v33 = vmul.f32 0.25, %v48_v24 }
   0xa   :  { %8 = vsyncpa [#allocation3], 0  ;;  %v54_v35 = vmul.f32 0.25, %v49_v28  ;;  %v50_v36 = vadd.f32 %v170_v23, %v39_v29  ;;  %v51_v37 = vadd.f32 %v171_v25, %v40_v30  ;;  %v41_v38 = vadd.f32 %v167_v32, %v30_v31  ;;  %62 = vperm.xlu0 %205, %v59_v34   ;;  %v172_v39 = vld [vmem:[%s333_s0 + $0x98] sm:$0xf]  ;;  %v58_v46 = vld [vmem:[%s334_s1] sm:$0xff] }
   0xb   :  { %vm69_vm1 = vcmask 1043456   ;;  %vm65_vm2 = vcmask 293888   ;;  %s234_s0 = smov [#allocation2]  }
   0xc   :  { %v195_v40 = vpack.c.bf16 %v54_v35, %v53_v33  ;;  %v55_v41 = vmul.f32 0.25, %v50_v36  ;;  %v56_v42 = vmul.f32 0.25, %v51_v37  ;;  %v52_v44 = vadd.f32 %v172_v39, %v41_v38  ;;  %s150_s28 = sshll.u32 %s234_s0, 4  ;;  %s151_s28 = int_to_ptr.vmem [resolvable:$true] %s150_s28 }
   0xd   :  { %s206_s29 = scalar_lea.vmem %s151_s28, 128  ;;  %p211_p1 = scmp.lt.s32.totalorder %s151_s28, %s151_s28 }
   0xe   :  { %196 = vmatpush3.bf16.msra.mxu0 %v195_v40  ;;  %v198_v43 = vpack.c.bf16 %v56_v42, %v55_v41  ;;  %v57_v45 = vmul.f32 0.25, %v52_v44  ;;  %p207_p0 = scmp.ne.s32.totalorder %s151_s28, %s206_s29  ;;  %p212_p2 = scmp.lt.s32.totalorder %s206_s29, %s206_s29 }
   0xf   :  { %197 = vmatprep.subr.bf16.mxu0 %v230_v3 }
  0x10   :  { %p213_p3 = por %p212_p2, %p211_p1 }
  0x12   :  { %199 = vmatpush3.bf16.msra.mxu0 %v198_v43  ;;  %p214_p4 = pnand %p213_p3, %p207_p0 }
  0x13   :  { %189 = vmatprep.subr.mxu0 %v232_v12 }
  0x16   :  { %190 = vmatpush3.msk.msra.mxu0 %vm69_vm1, %v57_v45 }
  0x17   :  { %192 = vmatmul.mubr.msk.f32.vlgmr.msra.gmra.mrb[0].mxu0 %vm65_vm2, %v58_v46 }
  0x89   :  { %v63_v47 = vpop.permute.xlu0 %62 }
  0xea   :  { %v139_v48 = vpop.f32.mrb[0].mxu0 }
  0xeb   :  { %v140_v49 = vadd.f32 %v139_v48, %v63_v47  ;;  %v193_v50 = vpop.f32.mrb[1].mxu0 }
  0xed   :  { %143 = vst [vmem:[#allocation2] sm:$0xff] %v140_v49 }
  0xee   :  { %217 = shalt.err (!%p214_p4)
}
  0xef   :  { %s218_s4 = scalar_lea.hbm %s336_s3, 128 }
  0xf0   :  { %p219_p5 = scmp.ne.s32.totalorder %s336_s3, %s218_s4  ;;  %p222_p6 = scmp.lt.u32.totalorder %s218_s4, %s336_s3 }
  0xf2   :  { %p224_p7 = pnand %p222_p6, %p219_p5 }
  0xf4   :  { %227 = shalt.err (!%p224_p7)
}
  0xf5   :  { %153 = dma.vmem_to_hbm [thread:$0]  %s151_s28, 128, %s336_s3, [#allocation3]  }
  0xf6   :  { %228 = dma.done.wait [#allocation3], 128  }
  0xf7   :  { %229 = vsyncadd [#allocation3], 4294967168 }
  0xf8   :  { %157 = vsyncpa [#allocation3], 1 }

</bundles_post_ra>
